<compile_context>
chip_gen: v7x
topology: tpu7x:2x2x1
jax: 0.10.0
libtpu: 0.0.40
codegen_flags: <defaults>
</compile_context>

<pallas_src>
import functools

import numpy as np

import jax
import jax.numpy as jnp
from jax.experimental import pallas as pl
from jax.experimental.pallas import tpu as pltpu


_SLAB_BYTES = 4 * 1024 * 1024      # per-step input slab; fits v5e/v6e/v7x scoped VMEM
_TARGET_CHUNK = 512                # flat input elements per matmul row -> 128-lane output


def _num_bf16_splits(dtype):
    dt = jnp.dtype(dtype)
    if dt == jnp.dtype(jnp.bfloat16):
        return 1
    if dt == jnp.dtype(jnp.float16):
        return 2
    if dt == jnp.dtype(jnp.float32):
        return 3
    # TODO(synk): integer/bool dtypes would need a non-MXU gather path (v7x MXU has no
    # int mode); this module only ever sees float activations, so keep it float-only.
    raise NotImplementedError(f"downsample_stride: unsupported dtype {dt}")


def _build_selection_matrix(chunk, H, W, per_image):
    """Constant 0/1 matrix S (chunk, n_keep): out_row = in_row @ S does the ::2,::2 gather."""
    p = np.arange(chunk)
    if per_image:
        # chunk is a whole number of images; recover (row, col) within each image.
        q = p % (H * W)
        keep = (((q // W) % 2) == 0) & (((q % W) % 2) == 0)
    else:
        # H and W even, chunk % (2*W) == 0: row parity = (p // W) % 2, col parity = p % 2.
        keep = (((p // W) % 2) == 0) & ((p % 2) == 0)
    src = np.nonzero(keep)[0]
    sel = np.zeros((chunk, src.size), dtype=np.float32)
    sel[src, np.arange(src.size)] = 1.0
    return sel


def _gather_matmul_kernel(x_ref, s_ref, o_ref, *, n_splits):
    # x_ref: (t_rows, F)  s_ref: (F, F_out)  o_ref: (t_rows, F_out)
    s = s_ref[...]
    x = x_ref[...]
    # Exact gather via bf16 MXU passes: with one-hot 0/1 weights and f32 accumulation,
    # each pass contributes its bf16 split term exactly; the splits sum exactly to x.
    part = x.astype(jnp.bfloat16)
    acc = jnp.dot(part, s, preferred_element_type=jnp.float32)
    if n_splits > 1:
        r = x.astype(jnp.float32)
        for _ in range(n_splits - 1):
            r = r - part.astype(jnp.float32)
            part = r.astype(jnp.bfloat16)
            acc = acc + jnp.dot(part, s, preferred_element_type=jnp.float32)
    o_ref[...] = acc.astype(o_ref.dtype)


@jax.jit
def downsample_stride(x):
    """x: (B, C, H, W). Returns x[..., ::2, ::2] (NCHW), computed in one Pallas pass."""
    B, C, H, W = x.shape
    H_out, W_out = (H + 1) // 2, (W + 1) // 2
    n_splits = _num_bf16_splits(x.dtype)

    total = B * C * H * W
    even = (H % 2 == 0) and (W % 2 == 0)
    period = 2 * W if even else H * W                    # keep-pattern period in flat index
    out_per_period = (W // 2) if even else (H_out * W_out)

    # Chunk = a few periods, aiming at ~512 input lanes (=> ~128-lane dense output rows).
    periods_total = total // period
    f = 1
    for cand in range(min(max(1, _TARGET_CHUNK // period), periods_total), 0, -1):
        if periods_total % cand == 0:
            f = cand
            break
    F = f * period
    F_out = f * out_per_period
    rows = total // F

    sel = jnp.asarray(_build_selection_matrix(F, H, W, per_image=not even),
                      dtype=jnp.bfloat16)

    # Row blocking: large slabs (amortize ~0.35us/step), block rows a multiple of 8
    # sublanes (or the full extent), and at least 2 grid steps when possible so both
    # v7x TensorCores get work under dimension_semantics=("parallel",).
    itemsize = jnp.dtype(x.dtype).itemsize
    slab_rows = max(8, (_SLAB_BYTES // max(1, F * itemsize)) // 8 * 8)
    if rows <= 8:
        t_rows = rows                                    # single full block
    else:
        t_rows = max(8, (min(slab_rows, pl.cdiv(rows, 2)) // 8) * 8)

    out_flat = pl.pallas_call(
        functools.partial(_gather_matmul_kernel, n_splits=n_splits),
        out_shape=jax.ShapeDtypeStruct((rows, F_out), x.dtype),
        grid=(pl.cdiv(rows, t_rows),),
        in_specs=[
            pl.BlockSpec((t_rows, F), lambda m: (m, 0)),      # lane-dense input slab
            pl.BlockSpec((F, F_out), lambda m: (0, 0)),       # S: resident, fetched once
        ],
        out_specs=pl.BlockSpec((t_rows, F_out), lambda m: (m, 0)),  # lane-dense output
        compiler_params=pltpu.CompilerParams(
            dimension_semantics=("parallel",),
            vmem_limit_bytes=32 * 1024 * 1024,
        ),
    )(x.reshape(rows, F), sel)

    # Metadata-only reshape back to NCHW output layout.
    return out_flat.reshape(B, C, H_out, W_out)


def _reference(x):
    return x[..., ::2, ::2]


if __name__ == "__main__":
    # Primary check: shapes consistent with the module (batch=2, channels=4, spatial=16).
    x = jax.random.normal(jax.random.PRNGKey(0), (2, 4, 16, 16), dtype=jnp.float32)
    out = jax.block_until_ready(downsample_stride(x))
    ref = _reference(x)
    assert out.shape == ref.shape, (out.shape, ref.shape)
    assert jnp.array_equal(out, ref), "f32 16x16: mismatch vs reference strided slice"

    # bf16, larger feature map, multi-step grid with a ragged final block.
    xb = jax.random.normal(jax.random.PRNGKey(1), (4, 5, 32, 32), dtype=jnp.bfloat16)
    outb = jax.block_until_ready(downsample_stride(xb))
    assert jnp.array_equal(outb, _reference(xb)), "bf16 32x32: mismatch vs reference"

    # Odd spatial sizes exercise the per-image selection-matrix path.
    xo = jax.random.normal(jax.random.PRNGKey(2), (2, 3, 7, 9), dtype=jnp.float32)
    outo = jax.block_until_ready(downsample_stride(xo))
    assert jnp.array_equal(outo, _reference(xo)), "odd 7x9: mismatch vs reference"

    print("KERNEL_OK")
</pallas_src>

<mosaic_0001>
module attributes {stable_mosaic.version = 11 : i64} {
  func.func @_gather_matmul_kernel(%arg0: i32, %arg1: memref<4x512xf32, #tpu.memory_space<vmem>>, %arg2: memref<512x128xbf16, #tpu.memory_space<vmem>>, %arg3: memref<4x128xf32, #tpu.memory_space<vmem>>) attributes {dimension_semantics = [#tpu.dimension_semantics<parallel>], iteration_bounds = array<i64: 1>, scalar_prefetch = 0 : i64, scratch_operands = 0 : i64, tpu.core_type = #tpu.core_type<tc>, window_params = [{transform_indices = @transform_0, window_bounds = array<i64: 4, 512>}, {pipeline_mode = #tpu.pipeline_mode<synchronous>, transform_indices = @transform_1, window_bounds = array<i64: 512, 128>}, {transform_indices = @transform_2, window_bounds = array<i64: 4, 128>}]} {
    %c0 = arith.constant 0 : index
    %c0_0 = arith.constant 0 : index
    %0 = vector.load %arg2[%c0, %c0_0] : memref<512x128xbf16, #tpu.memory_space<vmem>>, vector<512x128xbf16>
    %c0_1 = arith.constant 0 : index
    %c0_2 = arith.constant 0 : index
    %1 = vector.load %arg1[%c0_1, %c0_2] : memref<4x512xf32, #tpu.memory_space<vmem>>, vector<4x512xf32>
    %2 = arith.truncf %1 : vector<4x512xf32> to vector<4x512xbf16>
    %cst = arith.constant dense<0.000000e+00> : vector<4x128xf32>
    %3 = tpu.matmul %2, %0, %cst {dimension_numbers = #tpu.dot_dimension_numbers<[1], [0], [0], [1], [0, 0, 1, 1], [], []>} : vector<4x512xbf16>, vector<512x128xbf16>, vector<4x128xf32> -> vector<4x128xf32>
    %4 = arith.extf %2 : vector<4x512xbf16> to vector<4x512xf32>
    %5 = arith.subf %1, %4 : vector<4x512xf32>
    %6 = arith.truncf %5 : vector<4x512xf32> to vector<4x512xbf16>
    %cst_3 = arith.constant dense<0.000000e+00> : vector<4x128xf32>
    %7 = tpu.matmul %6, %0, %cst_3 {dimension_numbers = #tpu.dot_dimension_numbers<[1], [0], [0], [1], [0, 0, 1, 1], [], []>} : vector<4x512xbf16>, vector<512x128xbf16>, vector<4x128xf32> -> vector<4x128xf32>
    %8 = arith.addf %3, %7 : vector<4x128xf32>
    %9 = arith.extf %6 : vector<4x512xbf16> to vector<4x512xf32>
    %10 = arith.subf %5, %9 : vector<4x512xf32>
    %11 = arith.truncf %10 : vector<4x512xf32> to vector<4x512xbf16>
    %cst_4 = arith.constant dense<0.000000e+00> : vector<4x128xf32>
    %12 = tpu.matmul %11, %0, %cst_4 {dimension_numbers = #tpu.dot_dimension_numbers<[1], [0], [0], [1], [0, 0, 1, 1], [], []>} : vector<4x512xbf16>, vector<512x128xbf16>, vector<4x128xf32> -> vector<4x128xf32>
    %13 = arith.addf %8, %12 : vector<4x128xf32>
    %c0_5 = arith.constant 0 : index
    %c0_6 = arith.constant 0 : index
    %14 = vector.load %arg3[%c0_5, %c0_6] : memref<4x128xf32, #tpu.memory_space<vmem>>, vector<4x128xf32>
    tpu.vector_store %arg3[%c0_5, %c0_6], %13 {strides = array<i32>} : memref<4x128xf32, #tpu.memory_space<vmem>>, vector<4x128xf32>,
    return
  }
  func.func @transform_0(%arg0: i32) -> (i32, i32) {
    %c0_i32 = arith.constant 0 : i32
    %c0_i32_0 = arith.constant 0 : i32
    return %arg0, %c0_i32 : i32, i32
  }
  func.func @transform_1(%arg0: i32) -> (i32, i32) {
    %c0_i32 = arith.constant 0 : i32
    %c0_i32_0 = arith.constant 0 : i32
    %c0_i32_1 = arith.constant 0 : i32
    return %c0_i32, %c0_i32_0 : i32, i32
  }
  func.func @transform_2(%arg0: i32) -> (i32, i32) {
    %c0_i32 = arith.constant 0 : i32
    %c0_i32_0 = arith.constant 0 : i32
    return %arg0, %c0_i32 : i32, i32
  }
}

</mosaic_0001>

<bundles_post_ra>
// kernel: downsample_stride.1
= control target key start
LH: loop header
LB: loop body
LE: loop exit
PB: predicated region body
PF: predicated region fallthrough
CT: control target
= control target key end

     0   :  { %7 = vsyncpa [#allocation3], 0  ;;  %s814_s9 = smov [#allocation2]   ;;  %s1021_s0 = inlined_call_operand.vmem [shape: f32[4,512], index: 0, kind: input, shape index: {}]   ;;  %s1022_s1 = inlined_call_operand.hbm [shape: bf16[512,128], index: 1, kind: input, shape index: {}]   ;;  %s1023_s2 = inlined_call_operand.vmem [shape: f32[4,128], index: 2, kind: output, shape index: {}]  }
   0x1   :  { %s15_s10 = sshll.u32 %s814_s9, 4  ;;  %s790_s13 = scalar_lea.hbm %s1022_s1, 4096  ;;  %s16_s10 = int_to_ptr.vmem [resolvable:$true] %s15_s10 }
   0x2   :  { %p791_p0 = scmp.ne.s32.totalorder %s1022_s1, %s790_s13  ;;  %p794_p1 = scmp.lt.u32.totalorder %s790_s13, %s1022_s1 }
   0x4   :  { %p796_p2 = pnand %p794_p1, %p791_p0 }
   0x6   :  { %799 = shalt.err (!%p796_p2)
}
   0x7   :  { %s800_s18 = scalar_lea.vmem %s16_s10, 4096  ;;  %p805_p4 = scmp.lt.s32.totalorder %s16_s10, %s16_s10 }
   0x8   :  { %p801_p3 = scmp.ne.s32.totalorder %s16_s10, %s800_s18  ;;  %p806_p5 = scmp.lt.s32.totalorder %s800_s18, %s800_s18 }
   0xa   :  { %p807_p6 = por %p806_p5, %p805_p4 }
   0xc   :  { %p808_p7 = pnand %p807_p6, %p801_p3 }
   0xe   :  { %811 = shalt.err (!%p808_p7)
}
   0xf   :  { %s815_s19 = smov 64   ;;  %s816_s20 = smov 4  }
  0x10   :  { %21 = dma.hbm_to_vmem [thread:$0]  %s1022_s1, 4096, %s16_s10, [#allocation3], %s815_s19, %s815_s19, %s816_s20  }
  0x11   :  { %812 = dma.done.wait [#allocation3], 4096  }
  0x12   :  { %813 = vsyncadd [#allocation3], 4294963200  ;;  %v844_v0 = vld [vmem:[#allocation2 + $0x40] sm:$0xff]   ;;  %v855_v4 = vld [vmem:[#allocation2 + $0x48] sm:$0xff]  }
  0x13   :  { %v846_v1 = vld [vmem:[#allocation2 + $0xc0] sm:$0xff]   ;;  %621 = vmatprep.subr.bf16.mxu0 %v844_v0  ;;  %v858_v5 = vld [vmem:[#allocation2 + $0xc8] sm:$0xff]   ;;  %v867_v8 = vld [vmem:[#allocation2 + $0x50] sm:$0xff]  }
  0x14   :  { %v849_v2 = vld [vmem:[#allocation2] sm:$0xff]   ;;  %643 = vmatprep.subr.bf16.mxu1 %v846_v1  ;;  %v861_v6 = vld [vmem:[#allocation2 + $0x8] sm:$0xff]   ;;  %v870_v9 = vld [vmem:[#allocation2 + $0xd0] sm:$0xff]  }
  0x15   :  { %v852_v3 = vld [vmem:[#allocation2 + $0x80] sm:$0xff]   ;;  %622 = vmatpush3.bf16.msra.mxu0 %v849_v2  ;;  %v864_v7 = vld [vmem:[#allocation2 + $0x88] sm:$0xff]   ;;  %v873_v10 = vld [vmem:[#allocation2 + $0x10] sm:$0xff]  }
  0x16   :  { %644 = vmatpush3.bf16.msra.mxu1 %v852_v3  ;;  %623 = vmatprep.subr.bf16.mxu0 %v855_v4  ;;  %v876_v11 = vld [vmem:[#allocation2 + $0x90] sm:$0xff]   ;;  %v879_v12 = vld [vmem:[#allocation2 + $0x58] sm:$0xff]   ;;  %v891_v16 = vld [vmem:[#allocation2 + $0x60] sm:$0xff]  }
  0x17   :  { %645 = vmatprep.subr.bf16.mxu1 %v858_v5  ;;  %v882_v13 = vld [vmem:[#allocation2 + $0xd8] sm:$0xff]   ;;  %v894_v17 = vld [vmem:[#allocation2 + $0xe0] sm:$0xff]   ;;  %v903_v20 = vld [vmem:[#allocation2 + $0x68] sm:$0xff]  }
  0x18   :  { %v885_v14 = vld [vmem:[#allocation2 + $0x18] sm:$0xff]   ;;  %v897_v18 = vld [vmem:[#allocation2 + $0x20] sm:$0xff]   ;;  %v906_v21 = vld [vmem:[#allocation2 + $0xe8] sm:$0xff]  }
  0x19   :  { %624 = vmatpush3.bf16.msra.mxu0 %v861_v6  ;;  %v888_v15 = vld [vmem:[#allocation2 + $0x98] sm:$0xff]   ;;  %v900_v19 = vld [vmem:[#allocation2 + $0xa0] sm:$0xff]   ;;  %v909_v22 = vld [vmem:[#allocation2 + $0x28] sm:$0xff]  }
  0x1a   :  { %646 = vmatpush3.bf16.msra.mxu1 %v864_v7  ;;  %625 = vmatprep.subr.bf16.mxu0 %v867_v8  ;;  %v912_v23 = vld [vmem:[#allocation2 + $0xa8] sm:$0xff]   ;;  %v915_v24 = vld [vmem:[#allocation2 + $0x70] sm:$0xff]   ;;  %v927_v28 = vld [vmem:[#allocation2 + $0x78] sm:$0xff]  }
  0x1b   :  { %647 = vmatprep.subr.bf16.mxu1 %v870_v9  ;;  %v918_v25 = vld [vmem:[#allocation2 + $0xf0] sm:$0xff]   ;;  %v930_v29 = vld [vmem:[#allocation2 + $0xf8] sm:$0xff]   ;;  %v90_v32 = vld [vmem:[%s1021_s0] sm:$0xff] }
  0x1c   :  { %v921_v26 = vld [vmem:[#allocation2 + $0x30] sm:$0xff]   ;;  %v933_v30 = vld [vmem:[#allocation2 + $0x38] sm:$0xff]   ;;  %v91_v33 = vld [vmem:[%s1021_s0 + $0x8] sm:$0xff]  ;;  %v94_v34 = vcombine.high %v90_v32, %v90_v32  ;;  %v946_v35 = vpack.c.bf16 %v90_v32, %v90_v32 }
  0x1d   :  { %626 = vmatpush3.bf16.msra.mxu0 %v873_v10  ;;  %v924_v27 = vld [vmem:[#allocation2 + $0xb0] sm:$0xff]   ;;  %v936_v31 = vld [vmem:[#allocation2 + $0xb8] sm:$0xff]   ;;  %v95_v36 = vcombine.high %v91_v33, %v91_v33  ;;  %v948_v37 = vpack.c.bf16 %v91_v33, %v91_v33 }
  0x1e   :  { %648 = vmatpush3.bf16.msra.mxu1 %v876_v11  ;;  %627 = vmatprep.subr.bf16.mxu0 %v879_v12  ;;  %v99_v38 = vpack.c.bf16 %v94_v34, %v94_v34  ;;  %v102_v39 = vunpack.c.l.bf16 %v946_v35 }
  0x1f   :  { %649 = vmatprep.subr.bf16.mxu1 %v882_v13  ;;  %v101_v40 = vpack.c.bf16 %v95_v36, %v95_v36  ;;  %v104_v41 = vunpack.c.l.bf16 %v948_v37 }
  0x20   :  { %v103_v42 = vunpack.c.l.bf16 %v99_v38 }
  0x21   :  { %628 = vmatpush3.bf16.msra.mxu0 %v885_v14  ;;  %v105_v43 = vunpack.c.l.bf16 %v101_v40 }
  0x22   :  { %650 = vmatpush3.bf16.msra.mxu1 %v888_v15  ;;  %629 = vmatprep.subr.bf16.mxu0 %v891_v16  ;;  %v110_v44 = vcombine.low %v102_v39, %v103_v42 }
  0x23   :  { %651 = vmatprep.subr.bf16.mxu1 %v894_v17  ;;  %v111_v45 = vcombine.low %v104_v41, %v105_v43 }
  0x24   :  { %v114_v46 = vsub.f32 %v90_v32, %v110_v44 }
  0x25   :  { %630 = vmatpush3.bf16.msra.mxu0 %v897_v18  ;;  %v115_v47 = vsub.f32 %v91_v33, %v111_v45 }
  0x26   :  { %652 = vmatpush3.bf16.msra.mxu1 %v900_v19  ;;  %631 = vmatprep.subr.bf16.mxu0 %v903_v20  ;;  %v118_v48 = vcombine.high %v114_v46, %v114_v46  ;;  %v122_v50 = vpack.c.bf16 %v114_v46, %v114_v46 }
  0x27   :  { %653 = vmatprep.subr.bf16.mxu1 %v906_v21  ;;  %v119_v49 = vcombine.high %v115_v47, %v115_v47  ;;  %v124_v51 = vpack.c.bf16 %v115_v47, %v115_v47 }
  0x28   :  { %v123_v52 = vpack.c.bf16 %v118_v48, %v118_v48  ;;  %v478_v56 = vunpack.c.l.bf16 %v122_v50 }
  0x29   :  { %632 = vmatpush3.bf16.msra.mxu0 %v909_v22  ;;  %v125_v53 = vpack.c.bf16 %v119_v49, %v119_v49  ;;  %v480_v57 = vunpack.c.l.bf16 %v124_v51 }
  0x2a   :  { %654 = vmatpush3.bf16.msra.mxu1 %v912_v23  ;;  %633 = vmatprep.subr.bf16.mxu0 %v915_v24  ;;  %v479_v54 = vunpack.c.l.bf16 %v123_v52 }
  0x2b   :  { %655 = vmatprep.subr.bf16.mxu1 %v918_v25  ;;  %350 = vmatprep.mubr.bf16.mxu0 %v123_v52  ;;  %v481_v55 = vunpack.c.l.bf16 %v125_v53 }
  0x2c   :  { %390 = vmatprep.mubr.bf16.mxu1 %v125_v53  ;;  %v486_v58 = vcombine.low %v478_v56, %v479_v54 }
  0x2d   :  { %634 = vmatpush3.bf16.msra.mxu0 %v921_v26  ;;  %v487_v59 = vcombine.low %v480_v57, %v481_v55 }
  0x2e   :  { %656 = vmatpush3.bf16.msra.mxu1 %v924_v27  ;;  %635 = vmatprep.subr.bf16.mxu0 %v927_v28  ;;  %v490_v60 = vsub.f32 %v114_v46, %v486_v58 }
  0x2f   :  { %657 = vmatprep.subr.bf16.mxu1 %v930_v29  ;;  %v491_v61 = vsub.f32 %v115_v47, %v487_v59 }
  0x30   :  { %v494_v62 = vcombine.high %v490_v60, %v490_v60 }
  0x31   :  { %636 = vmatpush3.bf16.msra.mxu0 %v933_v30  ;;  %v495_v63 = vcombine.high %v491_v61, %v491_v61 }
  0x32   :  { %658 = vmatpush3.bf16.msra.mxu1 %v936_v31  ;;  %665 = vmatprep.subr.bf16.mxu0 %v844_v0  ;;  %v499_v32 = vpack.c.bf16 %v494_v62, %v494_v62 }
  0x33   :  { %687 = vmatprep.subr.bf16.mxu1 %v846_v1  ;;  %v501_v33 = vpack.c.bf16 %v495_v63, %v495_v63 }
  0x34   :  { %351 = vmatmul.mubr.bf16.vlgmr.msra.gmra.mrb[0].mxu0 %v122_v50 }
  0x35   :  { %391 = vmatmul.mubr.bf16.vlgmr.msra.gmra.mrb[0].mxu1 %v124_v51  ;;  %666 = vmatpush3.bf16.msra.mxu0 %v849_v2 }
  0x36   :  { %688 = vmatpush3.bf16.msra.mxu1 %v852_v3  ;;  %667 = vmatprep.subr.bf16.mxu0 %v855_v4 }
  0x37   :  { %689 = vmatprep.subr.bf16.mxu1 %v858_v5  ;;  %430 = vmatprep.mubr.bf16.mxu0 %v99_v38 }
  0x38   :  { %470 = vmatprep.mubr.bf16.mxu1 %v101_v40 }
  0x39   :  { %668 = vmatpush3.bf16.msra.mxu0 %v861_v6 }
  0x3a   :  { %690 = vmatpush3.bf16.msra.mxu1 %v864_v7  ;;  %669 = vmatprep.subr.bf16.mxu0 %v867_v8 }
  0x3b   :  { %691 = vmatprep.subr.bf16.mxu1 %v870_v9 }
  0x3d   :  { %670 = vmatpush3.bf16.msra.mxu0 %v873_v10 }
  0x3e   :  { %692 = vmatpush3.bf16.msra.mxu1 %v876_v11  ;;  %671 = vmatprep.subr.bf16.mxu0 %v879_v12 }
  0x3f   :  { %693 = vmatprep.subr.bf16.mxu1 %v882_v13 }
  0x41   :  { %672 = vmatpush3.bf16.msra.mxu0 %v885_v14 }
  0x42   :  { %694 = vmatpush3.bf16.msra.mxu1 %v888_v15  ;;  %673 = vmatprep.subr.bf16.mxu0 %v891_v16 }
  0x43   :  { %695 = vmatprep.subr.bf16.mxu1 %v894_v17 }
  0x45   :  { %674 = vmatpush3.bf16.msra.mxu0 %v897_v18 }
  0x46   :  { %696 = vmatpush3.bf16.msra.mxu1 %v900_v19  ;;  %675 = vmatprep.subr.bf16.mxu0 %v903_v20 }
  0x47   :  { %697 = vmatprep.subr.bf16.mxu1 %v906_v21 }
  0x49   :  { %676 = vmatpush3.bf16.msra.mxu0 %v909_v22 }
  0x4a   :  { %698 = vmatpush3.bf16.msra.mxu1 %v912_v23  ;;  %677 = vmatprep.subr.bf16.mxu0 %v915_v24 }
  0x4b   :  { %699 = vmatprep.subr.bf16.mxu1 %v918_v25 }
  0x4d   :  { %678 = vmatpush3.bf16.msra.mxu0 %v921_v26 }
  0x4e   :  { %700 = vmatpush3.bf16.msra.mxu1 %v924_v27  ;;  %679 = vmatprep.subr.bf16.mxu0 %v927_v28 }
  0x4f   :  { %701 = vmatprep.subr.bf16.mxu1 %v930_v29 }
  0x51   :  { %680 = vmatpush3.bf16.msra.mxu0 %v933_v30 }
  0x52   :  { %702 = vmatpush3.bf16.msra.mxu1 %v936_v31  ;;  %709 = vmatprep.subr.bf16.mxu0 %v844_v0  ;;  %v498_v0 = vpack.c.bf16 %v490_v60, %v490_v60 }
  0x53   :  { %731 = vmatprep.subr.bf16.mxu1 %v846_v1  ;;  %v500_v1 = vpack.c.bf16 %v491_v61, %v491_v61 }
  0x54   :  { %431 = vmatmul.mubr.bf16.vlgmr.msra.gmra.mrb[4].mxu0 %v946_v35 }
  0x55   :  { %471 = vmatmul.mubr.bf16.vlgmr.msra.gmra.mrb[4].mxu1 %v948_v37  ;;  %710 = vmatpush3.bf16.msra.mxu0 %v849_v2 }
  0x56   :  { %732 = vmatpush3.bf16.msra.mxu1 %v852_v3  ;;  %711 = vmatprep.subr.bf16.mxu0 %v855_v4 }
  0x57   :  { %733 = vmatprep.subr.bf16.mxu1 %v858_v5  ;;  %534 = vmatprep.mubr.bf16.mxu0 %v499_v32 }
  0x58   :  { %574 = vmatprep.mubr.bf16.mxu1 %v501_v33 }
  0x59   :  { %712 = vmatpush3.bf16.msra.mxu0 %v861_v6 }
  0x5a   :  { %734 = vmatpush3.bf16.msra.mxu1 %v864_v7  ;;  %713 = vmatprep.subr.bf16.mxu0 %v867_v8 }
  0x5b   :  { %735 = vmatprep.subr.bf16.mxu1 %v870_v9 }
  0x5d   :  { %714 = vmatpush3.bf16.msra.mxu0 %v873_v10 }
  0x5e   :  { %736 = vmatpush3.bf16.msra.mxu1 %v876_v11  ;;  %715 = vmatprep.subr.bf16.mxu0 %v879_v12 }
  0x5f   :  { %737 = vmatprep.subr.bf16.mxu1 %v882_v13 }
  0x61   :  { %716 = vmatpush3.bf16.msra.mxu0 %v885_v14 }
  0x62   :  { %738 = vmatpush3.bf16.msra.mxu1 %v888_v15  ;;  %717 = vmatprep.subr.bf16.mxu0 %v891_v16 }
  0x63   :  { %739 = vmatprep.subr.bf16.mxu1 %v894_v17 }
  0x65   :  { %718 = vmatpush3.bf16.msra.mxu0 %v897_v18 }
  0x66   :  { %740 = vmatpush3.bf16.msra.mxu1 %v900_v19  ;;  %719 = vmatprep.subr.bf16.mxu0 %v903_v20 }
  0x67   :  { %741 = vmatprep.subr.bf16.mxu1 %v906_v21 }
  0x69   :  { %720 = vmatpush3.bf16.msra.mxu0 %v909_v22 }
  0x6a   :  { %742 = vmatpush3.bf16.msra.mxu1 %v912_v23  ;;  %721 = vmatprep.subr.bf16.mxu0 %v915_v24 }
  0x6b   :  { %743 = vmatprep.subr.bf16.mxu1 %v918_v25 }
  0x6d   :  { %722 = vmatpush3.bf16.msra.mxu0 %v921_v26 }
  0x6e   :  { %744 = vmatpush3.bf16.msra.mxu1 %v924_v27  ;;  %723 = vmatprep.subr.bf16.mxu0 %v927_v28 }
  0x6f   :  { %745 = vmatprep.subr.bf16.mxu1 %v930_v29 }
  0x71   :  { %724 = vmatpush3.bf16.msra.mxu0 %v933_v30 }
  0x72   :  { %746 = vmatpush3.bf16.msra.mxu1 %v936_v31 }
  0x74   :  { %535 = vmatmul.mubr.bf16.vlgmr.msra.gmra.mrb[8].mxu0 %v498_v0 }
  0x75   :  { %575 = vmatmul.mubr.bf16.vlgmr.msra.gmra.mrb[8].mxu1 %v500_v1 }
 0x107   :  { %v637_v2 = vpop.f32.mrb[0].mxu0 }
 0x108   :  { %v659_v3 = vpop.f32.mrb[0].mxu1  ;;  %v638_v4 = vpop.f32.mrb[1].mxu0 }
 0x109   :  { %v660_v5 = vpop.f32.mrb[1].mxu1  ;;  %v639_v6 = vadd.f32 %v638_v4, %v637_v2  ;;  %v640_v8 = vpop.f32.mrb[2].mxu0 }
 0x10a   :  { %v661_v7 = vadd.f32 %v660_v5, %v659_v3  ;;  %v662_v9 = vpop.f32.mrb[2].mxu1  ;;  %v641_v10 = vpop.f32.mrb[3].mxu0 }
 0x10b   :  { %v663_v11 = vpop.f32.mrb[3].mxu1 }
 0x10c   :  { %v393_v12 = vadd.f32 %v661_v7, %v639_v6 }
 0x127   :  { %v681_v13 = vpop.f32.mrb[4].mxu0 }
 0x128   :  { %v703_v14 = vpop.f32.mrb[4].mxu1  ;;  %v682_v15 = vpop.f32.mrb[5].mxu0 }
 0x129   :  { %v704_v16 = vpop.f32.mrb[5].mxu1  ;;  %v683_v17 = vadd.f32 %v682_v15, %v681_v13  ;;  %v684_v19 = vpop.f32.mrb[6].mxu0 }
 0x12a   :  { %v705_v18 = vadd.f32 %v704_v16, %v703_v14  ;;  %v706_v20 = vpop.f32.mrb[6].mxu1  ;;  %v685_v21 = vpop.f32.mrb[7].mxu0 }
 0x12b   :  { %v707_v22 = vpop.f32.mrb[7].mxu1  ;;  %v433_v23 = vadd.f32 %v683_v17, %v393_v12 }
 0x12d   :  { %v473_v24 = vadd.f32 %v705_v18, %v433_v23 }
 0x147   :  { %v725_v25 = vpop.f32.mrb[8].mxu0 }
 0x148   :  { %v747_v26 = vpop.f32.mrb[8].mxu1  ;;  %v726_v27 = vpop.f32.mrb[9].mxu0 }
 0x149   :  { %v748_v28 = vpop.f32.mrb[9].mxu1  ;;  %v727_v29 = vadd.f32 %v726_v27, %v725_v25  ;;  %v728_v31 = vpop.f32.mrb[10].mxu0 }
 0x14a   :  { %v749_v30 = vadd.f32 %v748_v28, %v747_v26  ;;  %v750_v34 = vpop.f32.mrb[10].mxu1  ;;  %v729_v35 = vpop.f32.mrb[11].mxu0 }
 0x14b   :  { %v751_v36 = vpop.f32.mrb[11].mxu1 }
 0x14c   :  { %v577_v37 = vadd.f32 %v749_v30, %v727_v29 }
 0x14e   :  { %v582_v38 = vadd.f32 %v577_v37, %v473_v24 }
 0x150   :  { %583 = vst [vmem:[%s1023_s2] sm:$0xf] %v582_v38 }
 0x151   :  { %588 = vsyncpa [#allocation3], 1 }

</bundles_post_ra>
